<compile_context>
chip_gen: v7x
topology: tpu7x:2x2x1
jax: 0.10.0
libtpu: 0.0.40
codegen_flags: <defaults>
</compile_context>

<pallas_src>
import math

import jax
import jax.numpy as jnp
from jax.experimental import pallas as pl
from jax.experimental.pallas import tpu as pltpu

# Module dims: MultiModalCrossAttention(text_dim=128, vision_dim=256, output_dim=128)
TEXT_DIM = 128
VIS_DIM = 256
C = min(TEXT_DIM, VIS_DIM)      # common_dim = 128
OUT_DIM = 128                   # output_dim
NUM_HEADS = 8
NUM_LAYERS = 2
LN_EPS = 1e-5
IN_DIM = TEXT_DIM + VIS_DIM     # 384: concatenated [text | vision] kernel input

BATCH = 64                      # small example batch


def _normalize(x):
    # PyTorch nn.LayerNorm statistics: biased variance, eps inside rsqrt.
    mean = jnp.mean(x, axis=-1, keepdims=True)
    var = jnp.mean((x - mean) ** 2, axis=-1, keepdims=True)
    return (x - mean) * jax.lax.rsqrt(var + LN_EPS)


def _layernorm(x, g, b):
    return _normalize(x) * g + b


# ------------------------------ kernel ---------------------------------------

def fusion_kernel(x_ref, w1_ref, w2_ref, pp_ref, fused_ref):
    f32 = jnp.float32
    x = x_ref[...]                        # (TILE_B, IN_DIM) = [text | vision], bf16/f32
    w2 = w2_ref[...]                      # (C, OUT_DIM)

    # ONE MXU call for text_projection + both collapsed attention layers:
    #   h[:, :C] = text @ tp_w + vision @ attn_w_l0   (pre-bias)
    #   h[:, C:] = vision @ attn_w_l1                 (pre-bias)
    h = jnp.dot(x, w1_ref[...], preferred_element_type=f32)
    h = h + pp_ref[0:1, :]                # packed row 0: fused biases (1, 2C)

    # Packed small params (all f32): row 1 = [g0 | be0], row 2 = [op_b_eff | op_g],
    # row 3 = [op_be | 0].  All slices are at 128-lane boundaries.
    g0, be0 = pp_ref[1:2, :C], pp_ref[1:2, C:]
    op_b = pp_ref[2:3, :OUT_DIM]
    op_g = pp_ref[2:3, C:C + OUT_DIM]
    op_be = pp_ref[3:4, :OUT_DIM]

    attended = _layernorm(h[:, :C], g0, be0)      # layer 0 LayerNorm
    attended = _normalize(attended + h[:, C:])    # layer 1 (affine folded into w2/op_b)

    # output_projection: Linear -> LayerNorm -> ReLU -> Dropout(0.1) (identity in eval)
    fused = jnp.dot(attended.astype(w2.dtype), w2, preferred_element_type=f32) + op_b
    fused = _layernorm(fused, op_g, op_be)
    # TODO(synk): training-mode Dropout(0.1) masking not implemented (eval-mode identity).
    fused_ref[...] = jnp.maximum(fused, 0.0)


def fuse(text, vision, w1, w2, packed, *, max_grid_steps=2):
    """One big batch tile per TensorCore.

    max_grid_steps=2 matches v7x's two TCs (grid shards across them via
    dimension_semantics=("parallel",)); on single-TC v5e/v6e the extra step is a
    single ~0.35 us of bookkeeping, negligible.  Remainder rows are zero-padded.
    """
    batch = text.shape[0]
    tile_b = max(8, 8 * pl.cdiv(pl.cdiv(batch, max_grid_steps), 8))  # sublane multiple
    n_steps = pl.cdiv(batch, tile_b)
    padded = n_steps * tile_b

    x = jnp.concatenate([text, vision], axis=1).astype(w1.dtype)     # (B, 384)
    if padded != batch:
        x = jnp.pad(x, ((0, padded - batch), (0, 0)))

    # Weights use constant index_maps so they stay VMEM-resident across steps.
    # (Footprint is tiny; Mosaic handles buffering for constant index_maps, so we
    #  skip pl.Buffered(1) — the potential saving here is < 0.5 MB of VMEM.)
    out = pl.pallas_call(
        fusion_kernel,
        out_shape=jax.ShapeDtypeStruct((padded, OUT_DIM), jnp.float32),
        grid=(n_steps,),
        in_specs=[
            pl.BlockSpec((tile_b, IN_DIM), lambda i: (i, 0)),   # [text | vision]
            pl.BlockSpec((IN_DIM, 2 * C), lambda i: (0, 0)),    # fused W1 (resident)
            pl.BlockSpec((C, OUT_DIM), lambda i: (0, 0)),       # op_w_eff (resident)
            pl.BlockSpec((8, 2 * C), lambda i: (0, 0)),         # packed biases/LN params
        ],
        out_specs=pl.BlockSpec((tile_b, OUT_DIM), lambda i: (i, 0)),
        compiler_params=pltpu.CompilerParams(
            dimension_semantics=("parallel",)),                 # shard across v7x's 2 TCs
    )(x, w1, w2, packed)
    return out[:batch]


# -------------------------- parameters ----------------------------------------

def init_params(key):
    """Raw module parameters (PyTorch [out, in] weights pre-transposed to [in, out])."""
    def lin(k, din, dout, scale=0.05):
        kw, kb = jax.random.split(k)
        w = jax.random.normal(kw, (din, dout), jnp.float32) * scale
        b = jax.random.normal(kb, (1, dout), jnp.float32) * scale
        return w, b

    keys = jax.random.split(key, 4 + NUM_LAYERS)
    tp_w, tp_b = lin(keys[0], TEXT_DIM, C)            # text_projection
    vp_w, vp_b = lin(keys[1], VIS_DIM, C)             # vision_projection

    layers = []
    for l in range(NUM_LAYERS):
        k1, k2, k3 = jax.random.split(keys[2 + l], 3)
        in_w, in_b = lin(k1, C, 3 * C)                # MHA in_proj (q,k,v stacked)
        out_w, out_b = lin(k2, C, C)                  # MHA out_proj
        kg, kb2 = jax.random.split(k3)
        ln_g = 1.0 + 0.1 * jax.random.normal(kg, (1, C), jnp.float32)
        ln_b = 0.1 * jax.random.normal(kb2, (1, C), jnp.float32)
        layers.append(dict(in_w=in_w, in_b=in_b, out_w=out_w, out_b=out_b,
                           ln_g=ln_g, ln_b=ln_b))

    op_w, op_b = lin(keys[2 + NUM_LAYERS], C, OUT_DIM)  # output_projection Linear
    kg, kb2 = jax.random.split(keys[3 + NUM_LAYERS])
    op_g = 1.0 + 0.1 * jax.random.normal(kg, (1, OUT_DIM), jnp.float32)
    op_be = 0.1 * jax.random.normal(kb2, (1, OUT_DIM), jnp.float32)

    return dict(tp_w=tp_w, tp_b=tp_b, vp_w=vp_w, vp_b=vp_b, layers=layers,
                op_w=op_w, op_b=op_b, op_g=op_g, op_be=op_be)


def precompose_params(p, dtype=jnp.bfloat16):
    """Eval-mode-only precomposition (attn dropout off, no add_bias_kv/add_zero_attn).

    Folds vision_projection -> Wv -> out_proj per layer, fuses text_projection into
    the same RHS, folds LayerNorm-1's affine into the output Linear, and packs all
    small row-params into one (8, 2C) array.  Precomposition done in f32; only the
    two matmul RHS matrices are cast to `dtype`.
    """
    assert OUT_DIM <= C, "param packing layout assumes output_dim <= common_dim"
    cols_w, cols_b = [], []
    for layer in p["layers"]:
        wv = layer["in_w"][:, 2 * C:]                 # value slice, (C, C)
        bv = layer["in_b"][:, 2 * C:]                 # (1, C)
        w_eff = wv @ layer["out_w"]                   # (C, C)
        b_eff = bv @ layer["out_w"] + layer["out_b"]  # (1, C)
        cols_w.append(p["vp_w"] @ w_eff)              # (VIS_DIM, C)
        cols_b.append(p["vp_b"] @ w_eff + b_eff)      # (1, C)
    attn_w = jnp.concatenate(cols_w, axis=1)          # (VIS_DIM, 2C)
    attn_b = jnp.concatenate(cols_b, axis=1)          # (1, 2C)

    # Single fused RHS for [text | vision] @ W1.
    w1 = jnp.zeros((IN_DIM, 2 * C), jnp.float32)
    w1 = w1.at[:TEXT_DIM, :C].set(p["tp_w"])
    w1 = w1.at[TEXT_DIM:, :].set(attn_w)
    b1 = jnp.concatenate([p["tp_b"] + attn_b[:, :C], attn_b[:, C:]], axis=1)  # (1, 2C)

    l0, l1 = p["layers"]
    # Fold LayerNorm-1 affine into the output-projection Linear (exact identity).
    op_w_eff = p["op_w"] * l1["ln_g"].T               # (C, OUT_DIM)
    op_b_eff = l1["ln_b"] @ p["op_w"] + p["op_b"]     # (1, OUT_DIM)

    packed = jnp.zeros((8, 2 * C), jnp.float32)
    packed = packed.at[0, :].set(b1[0])
    packed = packed.at[1, :C].set(l0["ln_g"][0])
    packed = packed.at[1, C:].set(l0["ln_b"][0])
    packed = packed.at[2, :OUT_DIM].set(op_b_eff[0])
    packed = packed.at[2, C:C + OUT_DIM].set(p["op_g"][0])
    packed = packed.at[3, :OUT_DIM].set(p["op_be"][0])

    return w1.astype(dtype), op_w_eff.astype(dtype), packed


# -------------------------- pure-JAX reference --------------------------------

def reference_forward(text, vision, p):
    """Mirrors the PyTorch forward exactly (full multi-head attention math, eval mode)."""
    bsz = text.shape[0]
    head_dim = C // NUM_HEADS
    tp = text @ p["tp_w"] + p["tp_b"]
    vp = vision @ p["vp_w"] + p["vp_b"]
    attended = tp[:, None, :]                         # unsqueeze(1): (B, 1, C)
    vproj = vp[:, None, :]
    for layer in p["layers"]:
        in_w, in_b = layer["in_w"], layer["in_b"]
        q = attended @ in_w[:, :C] + in_b[:, :C]
        k = vproj @ in_w[:, C:2 * C] + in_b[:, C:2 * C]
        v = vproj @ in_w[:, 2 * C:] + in_b[:, 2 * C:]
        qh = q.reshape(bsz, 1, NUM_HEADS, head_dim)
        kh = k.reshape(bsz, 1, NUM_HEADS, head_dim)
        vh = v.reshape(bsz, 1, NUM_HEADS, head_dim)
        scores = jnp.einsum("bqhd,bkhd->bhqk", qh, kh) / math.sqrt(head_dim)
        w = jax.nn.softmax(scores, axis=-1)           # single key -> exactly 1
        o = jnp.einsum("bhqk,bkhd->bqhd", w, vh).reshape(bsz, 1, C)
        attn_out = o @ layer["out_w"] + layer["out_b"]
        attended = _layernorm(attended + attn_out, layer["ln_g"], layer["ln_b"])
    x = attended[:, 0, :]                             # squeeze(1)
    fused = _layernorm(x @ p["op_w"] + p["op_b"], p["op_g"], p["op_be"])
    # Dropout(0.1) is identity in eval mode.
    return jnp.maximum(fused, 0.0)


if __name__ == "__main__":
    key = jax.random.PRNGKey(0)
    kt, kv, kp = jax.random.split(key, 3)
    text = jax.random.normal(kt, (BATCH, TEXT_DIM), jnp.float32)
    vision = jax.random.normal(kv, (BATCH, VIS_DIM), jnp.float32)

    raw_params = init_params(kp)
    ref = reference_forward(text, vision, raw_params)

    # f32 weights: tight check (only f32 rounding-order differs from reference).
    w1_f32, w2_f32, packed = precompose_params(raw_params, dtype=jnp.float32)
    fused_f32 = jax.block_until_ready(fuse(text, vision, w1_f32, w2_f32, packed))
    assert fused_f32.shape == ref.shape, f"shape mismatch {fused_f32.shape} vs {ref.shape}"
    assert jnp.allclose(fused_f32, ref, atol=1e-3, rtol=1e-3), (
        f"f32 mismatch, max_err={float(jnp.max(jnp.abs(fused_f32 - ref)))}")

    # bf16 matmul operands (MXU-native on v6e/v7x, halves weight/activation DMA):
    # loose tolerance accounts for bf16 quantization of inputs/weights.
    w1_bf, w2_bf, packed_bf = precompose_params(raw_params, dtype=jnp.bfloat16)
    fused_bf = jax.block_until_ready(fuse(text, vision, w1_bf, w2_bf, packed_bf))
    assert jnp.allclose(fused_bf, ref, atol=5e-2, rtol=5e-2), (
        f"bf16 mismatch, max_err={float(jnp.max(jnp.abs(fused_bf - ref)))}")

    print("KERNEL_OK")
</pallas_src>

<mosaic_0001>
module attributes {stable_mosaic.version = 11 : i64} {
  func.func @fusion_kernel(%arg0: i32, %arg1: memref<32x384xf32, #tpu.memory_space<vmem>>, %arg2: memref<384x256xf32, #tpu.memory_space<vmem>>, %arg3: memref<128x128xf32, #tpu.memory_space<vmem>>, %arg4: memref<8x256xf32, #tpu.memory_space<vmem>>, %arg5: memref<32x128xf32, #tpu.memory_space<vmem>>) attributes {dimension_semantics = [#tpu.dimension_semantics<parallel>], iteration_bounds = array<i64: 2>, scalar_prefetch = 0 : i64, scratch_operands = 0 : i64, tpu.core_type = #tpu.core_type<tc>, window_params = [{transform_indices = @transform_0, window_bounds = array<i64: 32, 384>}, {pipeline_mode = #tpu.pipeline_mode<synchronous>, transform_indices = @transform_1, window_bounds = array<i64: 384, 256>}, {pipeline_mode = #tpu.pipeline_mode<synchronous>, transform_indices = @transform_2, window_bounds = array<i64: 128, 128>}, {pipeline_mode = #tpu.pipeline_mode<synchronous>, transform_indices = @transform_3, window_bounds = array<i64: 8, 256>}, {transform_indices = @transform_4, window_bounds = array<i64: 32, 128>}]} {
    %c0 = arith.constant 0 : index
    %c0_0 = arith.constant 0 : index
    %0 = vector.load %arg1[%c0, %c0_0] : memref<32x384xf32, #tpu.memory_space<vmem>>, vector<32x384xf32>
    %c0_1 = arith.constant 0 : index
    %c0_2 = arith.constant 0 : index
    %1 = vector.load %arg3[%c0_1, %c0_2] : memref<128x128xf32, #tpu.memory_space<vmem>>, vector<128x128xf32>
    %c0_3 = arith.constant 0 : index
    %c0_4 = arith.constant 0 : index
    %2 = vector.load %arg2[%c0_3, %c0_4] : memref<384x256xf32, #tpu.memory_space<vmem>>, vector<384x256xf32>
    %cst = arith.constant dense<0.000000e+00> : vector<32x256xf32>
    %3 = tpu.matmul %0, %2, %cst {dimension_numbers = #tpu.dot_dimension_numbers<[1], [0], [0], [1], [0, 0, 1, 1], [], []>} : vector<32x384xf32>, vector<384x256xf32>, vector<32x256xf32> -> vector<32x256xf32>
    %c0_5 = arith.constant 0 : index
    %c0_6 = arith.constant 0 : index
    %4 = vector.load %arg4[%c0_5, %c0_6] : memref<8x256xf32, #tpu.memory_space<vmem>>, vector<1x256xf32>
    %5 = vector.broadcast %4 : vector<1x256xf32> to vector<32x256xf32>
    %6 = arith.addf %3, %5 : vector<32x256xf32>
    %c1 = arith.constant 1 : index
    %c0_7 = arith.constant 0 : index
    %7 = vector.load %arg4[%c1, %c0_7] : memref<8x256xf32, #tpu.memory_space<vmem>>, vector<1x128xf32>
    %c1_8 = arith.constant 1 : index
    %c128 = arith.constant 128 : index
    %8 = vector.load %arg4[%c1_8, %c128] : memref<8x256xf32, #tpu.memory_space<vmem>>, vector<1x128xf32>
    %c2 = arith.constant 2 : index
    %c0_9 = arith.constant 0 : index
    %9 = vector.load %arg4[%c2, %c0_9] : memref<8x256xf32, #tpu.memory_space<vmem>>, vector<1x128xf32>
    %c2_10 = arith.constant 2 : index
    %c128_11 = arith.constant 128 : index
    %10 = vector.load %arg4[%c2_10, %c128_11] : memref<8x256xf32, #tpu.memory_space<vmem>>, vector<1x128xf32>
    %c3 = arith.constant 3 : index
    %c0_12 = arith.constant 0 : index
    %11 = vector.load %arg4[%c3, %c0_12] : memref<8x256xf32, #tpu.memory_space<vmem>>, vector<1x128xf32>
    %12 = vector.extract_strided_slice %6 {offsets = [0, 0], sizes = [32, 128], strides = [1, 1]} : vector<32x256xf32> to vector<32x128xf32>
    %cst_13 = arith.constant dense<0.000000e+00> : vector<32xf32>
    %13 = vector.multi_reduction <add>, %12, %cst_13 [1] : vector<32x128xf32> to vector<32xf32>
    %14 = vector.shape_cast %13 : vector<32xf32> to vector<32x1xf32>
    %cst_14 = arith.constant 1.280000e+02 : f32
    %15 = vector.broadcast %cst_14 : f32 to vector<32x1xf32>
    %16 = arith.divf %14, %15 : vector<32x1xf32>
    %17 = vector.broadcast %16 : vector<32x1xf32> to vector<32x128xf32>
    %18 = arith.subf %12, %17 : vector<32x128xf32>
    %19 = arith.mulf %18, %18 : vector<32x128xf32>
    %cst_15 = arith.constant dense<0.000000e+00> : vector<32xf32>
    %20 = vector.multi_reduction <add>, %19, %cst_15 [1] : vector<32x128xf32> to vector<32xf32>
    %21 = vector.shape_cast %20 : vector<32xf32> to vector<32x1xf32>
    %cst_16 = arith.constant 1.280000e+02 : f32
    %22 = vector.broadcast %cst_16 : f32 to vector<32x1xf32>
    %23 = arith.divf %21, %22 : vector<32x1xf32>
    %24 = vector.broadcast %16 : vector<32x1xf32> to vector<32x128xf32>
    %25 = arith.subf %12, %24 : vector<32x128xf32>
    %cst_17 = arith.constant 9.99999974E-6 : f32
    %26 = vector.broadcast %cst_17 : f32 to vector<32x1xf32>
    %27 = arith.addf %23, %26 : vector<32x1xf32>
    %28 = math.rsqrt %27 : vector<32x1xf32>
    %29 = vector.broadcast %28 : vector<32x1xf32> to vector<32x128xf32>
    %30 = arith.mulf %25, %29 : vector<32x128xf32>
    %31 = vector.broadcast %7 : vector<1x128xf32> to vector<32x128xf32>
    %32 = arith.mulf %30, %31 : vector<32x128xf32>
    %33 = vector.broadcast %8 : vector<1x128xf32> to vector<32x128xf32>
    %34 = arith.addf %32, %33 : vector<32x128xf32>
    %35 = vector.extract_strided_slice %6 {offsets = [0, 128], sizes = [32, 128], strides = [1, 1]} : vector<32x256xf32> to vector<32x128xf32>
    %36 = arith.addf %34, %35 : vector<32x128xf32>
    %cst_18 = arith.constant dense<0.000000e+00> : vector<32xf32>
    %37 = vector.multi_reduction <add>, %36, %cst_18 [1] : vector<32x128xf32> to vector<32xf32>
    %38 = vector.shape_cast %37 : vector<32xf32> to vector<32x1xf32>
    %cst_19 = arith.constant 1.280000e+02 : f32
    %39 = vector.broadcast %cst_19 : f32 to vector<32x1xf32>
    %40 = arith.divf %38, %39 : vector<32x1xf32>
    %41 = vector.broadcast %40 : vector<32x1xf32> to vector<32x128xf32>
    %42 = arith.subf %36, %41 : vector<32x128xf32>
    %43 = arith.mulf %42, %42 : vector<32x128xf32>
    %cst_20 = arith.constant dense<0.000000e+00> : vector<32xf32>
    %44 = vector.multi_reduction <add>, %43, %cst_20 [1] : vector<32x128xf32> to vector<32xf32>
    %45 = vector.shape_cast %44 : vector<32xf32> to vector<32x1xf32>
    %cst_21 = arith.constant 1.280000e+02 : f32
    %46 = vector.broadcast %cst_21 : f32 to vector<32x1xf32>
    %47 = arith.divf %45, %46 : vector<32x1xf32>
    %48 = vector.broadcast %40 : vector<32x1xf32> to vector<32x128xf32>
    %49 = arith.subf %36, %48 : vector<32x128xf32>
    %cst_22 = arith.constant 9.99999974E-6 : f32
    %50 = vector.broadcast %cst_22 : f32 to vector<32x1xf32>
    %51 = arith.addf %47, %50 : vector<32x1xf32>
    %52 = math.rsqrt %51 : vector<32x1xf32>
    %53 = vector.broadcast %52 : vector<32x1xf32> to vector<32x128xf32>
    %54 = arith.mulf %49, %53 : vector<32x128xf32>
    %cst_23 = arith.constant dense<0.000000e+00> : vector<32x128xf32>
    %55 = tpu.matmul %54, %1, %cst_23 {dimension_numbers = #tpu.dot_dimension_numbers<[1], [0], [0], [1], [0, 0, 1, 1], [], []>} : vector<32x128xf32>, vector<128x128xf32>, vector<32x128xf32> -> vector<32x128xf32>
    %56 = vector.broadcast %9 : vector<1x128xf32> to vector<32x128xf32>
    %57 = arith.addf %55, %56 : vector<32x128xf32>
    %cst_24 = arith.constant dense<0.000000e+00> : vector<32xf32>
    %58 = vector.multi_reduction <add>, %57, %cst_24 [1] : vector<32x128xf32> to vector<32xf32>
    %59 = vector.shape_cast %58 : vector<32xf32> to vector<32x1xf32>
    %cst_25 = arith.constant 1.280000e+02 : f32
    %60 = vector.broadcast %cst_25 : f32 to vector<32x1xf32>
    %61 = arith.divf %59, %60 : vector<32x1xf32>
    %62 = vector.broadcast %61 : vector<32x1xf32> to vector<32x128xf32>
    %63 = arith.subf %57, %62 : vector<32x128xf32>
    %64 = arith.mulf %63, %63 : vector<32x128xf32>
    %cst_26 = arith.constant dense<0.000000e+00> : vector<32xf32>
    %65 = vector.multi_reduction <add>, %64, %cst_26 [1] : vector<32x128xf32> to vector<32xf32>
    %66 = vector.shape_cast %65 : vector<32xf32> to vector<32x1xf32>
    %cst_27 = arith.constant 1.280000e+02 : f32
    %67 = vector.broadcast %cst_27 : f32 to vector<32x1xf32>
    %68 = arith.divf %66, %67 : vector<32x1xf32>
    %69 = vector.broadcast %61 : vector<32x1xf32> to vector<32x128xf32>
    %70 = arith.subf %57, %69 : vector<32x128xf32>
    %cst_28 = arith.constant 9.99999974E-6 : f32
    %71 = vector.broadcast %cst_28 : f32 to vector<32x1xf32>
    %72 = arith.addf %68, %71 : vector<32x1xf32>
    %73 = math.rsqrt %72 : vector<32x1xf32>
    %74 = vector.broadcast %73 : vector<32x1xf32> to vector<32x128xf32>
    %75 = arith.mulf %70, %74 : vector<32x128xf32>
    %76 = vector.broadcast %10 : vector<1x128xf32> to vector<32x128xf32>
    %77 = arith.mulf %75, %76 : vector<32x128xf32>
    %78 = vector.broadcast %11 : vector<1x128xf32> to vector<32x128xf32>
    %79 = arith.addf %77, %78 : vector<32x128xf32>
    %cst_29 = arith.constant 0.000000e+00 : f32
    %80 = vector.broadcast %cst_29 : f32 to vector<32x128xf32>
    %81 = arith.maximumf %79, %80 : vector<32x128xf32>
    %c0_30 = arith.constant 0 : index
    %c0_31 = arith.constant 0 : index
    %82 = vector.load %arg5[%c0_30, %c0_31] : memref<32x128xf32, #tpu.memory_space<vmem>>, vector<32x128xf32>
    tpu.vector_store %arg5[%c0_30, %c0_31], %81 {strides = array<i32>} : memref<32x128xf32, #tpu.memory_space<vmem>>, vector<32x128xf32>,
    return
  }
  func.func @transform_0(%arg0: i32) -> (i32, i32) {
    %c0_i32 = arith.constant 0 : i32
    %c0_i32_0 = arith.constant 0 : i32
    return %arg0, %c0_i32 : i32, i32
  }
  func.func @transform_1(%arg0: i32) -> (i32, i32) {
    %c0_i32 = arith.constant 0 : i32
    %c0_i32_0 = arith.constant 0 : i32
    %c0_i32_1 = arith.constant 0 : i32
    return %c0_i32, %c0_i32_0 : i32, i32
  }
  func.func @transform_2(%arg0: i32) -> (i32, i32) {
    %c0_i32 = arith.constant 0 : i32
    %c0_i32_0 = arith.constant 0 : i32
    %c0_i32_1 = arith.constant 0 : i32
    return %c0_i32, %c0_i32_0 : i32, i32
  }
  func.func @transform_3(%arg0: i32) -> (i32, i32) {
    %c0_i32 = arith.constant 0 : i32
    %c0_i32_0 = arith.constant 0 : i32
    %c0_i32_1 = arith.constant 0 : i32
    return %c0_i32, %c0_i32_0 : i32, i32
  }
  func.func @transform_4(%arg0: i32) -> (i32, i32) {
    %c0_i32 = arith.constant 0 : i32
    %c0_i32_0 = arith.constant 0 : i32
    return %arg0, %c0_i32 : i32, i32
  }
}

</mosaic_0001>

<bundles_post_ra>
// kernel: tpu_custom_call.1
= control target key start
LH: loop header
LB: loop body
LE: loop exit
PB: predicated region body
PF: predicated region fallthrough
CT: control target
= control target key end

     0   :  { %9 = vsyncpa [#allocation3], 0  ;;  %s1790_s0 = inlined_call_operand.hbm [shape: f32[64,384], index: 0, kind: input, shape index: {}]   ;;  %s1791_s1 = inlined_call_operand.hbm [shape: f32[384,256], index: 1, kind: input, shape index: {}]   ;;  %s1792_s2 = inlined_call_operand.hbm [shape: f32[128,128], index: 2, kind: input, shape index: {}]   ;;  %s1793_s3 = inlined_call_operand.hbm [shape: f32[8,256], index: 3, kind: input, shape index: {}]   ;;  %s1794_s4 = inlined_call_operand.hbm [shape: f32[64,128], index: 4, kind: output, shape index: {}]  }
   0x1   :  { %11 = vsyncpa [#allocation3 + $0x1], 0 }
   0x2   :  { %12 = vsyncpa [#allocation6], 0 }
   0x3   :  { %13 = vsyncpa [#allocation9], 0 }
   0x4   :  { %14 = vsyncpa [#allocation4], 0 }
   0x5   :  { %16 = vsyncpa [#allocation4 + $0x1], 0  ;;  %s1506_s15 = smov 0   ;;  %s1508_s16 = smov 0  }
   0x6   :  { %s1510_s17 = smov 0   ;;  %s1512_s18 = smov 0  }
   0x7 LB: > { %s1527_s19 = sadd.s32 4294967295, %s1465_s18   ;;  %s942_s20 = sadd.s32 4294967294, %s1465_s18   ;;  %s1465_s18 = sphi %s1512_s18, %s1817_s18   ;;  %s1461_s17 = sphi %s1510_s17, %s1816_s17   ;;  %s1457_s16 = sphi %s1508_s16, %s1815_s16   ;;  %s1453_s15 = sphi %s1506_s15, %s1814_s15  }
   0x8   : > { %p42_p0 = scmp.ne.s32.totalorder %s1457_s16, %s1453_s15  ;;  %p1795_p1 = scmp.eq.s32.totalorder %s1527_s19, 0 }
   0x9   : > { %p135_p3 = scmp.eq.s32.totalorder %s942_s20, 1  ;;  %p943_p5 = scmp.ge.s32.totalorder %s1465_s18, 1 }
   0xa   : > { %p1536_p4 = por %p1795_p1, %p42_p0  ;;  %p142_p7 = scmp.lt.s32.totalorder %s1465_s18, 3 }
   0xb   : > { %p1541_p6 = por %p135_p3, %p42_p0  ;;  %s1467_s24 = smov [#allocation5]  }
   0xc   : > { %s1798_s21 = scalar_select %p1536_p4, 1, 0 }
   0xd   : > { %s1799_s22 = scalar_select %p1541_p6, 1, 0 }
   0xe   : > { %p1546_p8 = pnand %p943_p5, %p142_p7  ;;  %s154_s25 = sshll.u32 %s1467_s24, 4  ;;  %s1550_s25 = int_to_ptr.vmem [resolvable:$true] %s154_s25 }
   0xf   : > { %s1468_s27 = smov [#allocation7]   ;;  %s1277_s5 = scalar_lea.hbm %s1791_s1, 12288 }
  0x10   : > { %s1800_s23 = scalar_select %p1546_p8, 1, 0 }
  0x11   : > { %p1183_p9 = pneg %p1546_p8  ;;  %s167_s28 = sshll.u32 %s1468_s27, 4  ;;  %s1561_s28 = int_to_ptr.vmem [resolvable:$true] %s167_s28 }
  0x12   : > { %p1278_p12 = scmp.ne.s32.totalorder %s1791_s1, %s1277_s5  ;;  %p1284_p5 = scmp.lt.u32.totalorder %s1277_s5, %s1791_s1 }
  0x13   : > { %p1557_p11 = pnand %p1183_p9, %p1795_p1 }
  0x15   : > { %p1571_p13 = pneg %p1557_p11 }
  0x17   : > { %p1280_p0 = pnand %p1571_p13, %p1278_p12 }
  0x19   : > { %p1281_p3 = pneg %p1280_p0 }
  0x1b   : > { %p1286_p7 = pnand %p1284_p5, %p1281_p3 }
  0x1d   : > { %1289 = shalt.err (!%p1286_p7)
}
  0x1e   : > { %s1290_s11 = scalar_lea.vmem %s1550_s25, 12288  ;;  %p1298_p2 = scmp.lt.s32.totalorder %s1550_s25, %s1550_s25 }
  0x1f   : > { %p1291_p9 = scmp.ne.s32.totalorder %s1550_s25, %s1290_s11  ;;  %p1299_p6 = scmp.lt.s32.totalorder %s1290_s11, %s1290_s11 }
  0x21   : > { %p1293_p10 = pnand %p1291_p9, %p1571_p13  ;;  %p1300_p12 = por %p1299_p6, %p1298_p2 }
  0x23   : > { %p1294_p1 = pneg %p1293_p10 }
  0x25   : > { %p1301_p0 = pnand %p1300_p12, %p1294_p1 }
  0x27   : > { %1304 = shalt.err (!%p1301_p0)
}
  0x28   : > { %s1469_s12 = smov 256   ;;  %s1470_s13 = smov 16  }
  0x29   : > { %1186 = dma.hbm_to_vmem [thread:$0]  (!%p1557_p11), %s1791_s1, 12288, %s1550_s25, [#allocation6], %s1469_s12, %s1469_s12, %s1470_s13  }
  0x2a   : > { %s1305_s29 = scalar_lea.hbm %s1792_s2, 2048 }
  0x2b   : > { %p1306_p2 = scmp.ne.s32.totalorder %s1792_s2, %s1305_s29  ;;  %p1312_p10 = scmp.lt.u32.totalorder %s1305_s29, %s1792_s2 }
  0x2d   : > { %p1308_p1 = pnand %p1306_p2, %p1571_p13 }
  0x2f   : > { %p1309_p6 = pneg %p1308_p1 }
  0x31   : > { %p1314_p3 = pnand %p1312_p10, %p1309_p6 }
  0x33   : > { %1317 = shalt.err (!%p1314_p3)
}
  0x34   : > { %s1318_s25 = scalar_lea.vmem %s1561_s28, 2048  ;;  %p1326_p12 = scmp.lt.s32.totalorder %s1561_s28, %s1561_s28 }
  0x35   : > { %p1319_p5 = scmp.ne.s32.totalorder %s1561_s28, %s1318_s25  ;;  %p1327_p0 = scmp.lt.s32.totalorder %s1318_s25, %s1318_s25 }
  0x37   : > { %p1321_p7 = pnand %p1319_p5, %p1571_p13  ;;  %p1328_p2 = por %p1327_p0, %p1326_p12 }
  0x39   : > { %p1322_p9 = pneg %p1321_p7 }
  0x3b   : > { %p1329_p1 = pnand %p1328_p2, %p1322_p9 }
  0x3d   : > { %1332 = shalt.err (!%p1329_p1)
}
  0x3e   : > { %s1471_s9 = smov 128   ;;  %s1472_s10 = smov 8  }
  0x3f   : > { %1189 = dma.hbm_to_vmem [thread:$0]  (!%p1557_p11), %s1792_s2, 2048, %s1561_s28, [#allocation6], %s1471_s9, %s1471_s9, %s1472_s10  }
  0x40   : > { %s1473_s13 = smov [#allocation8]   ;;  %s1616_s20 = sadd.s32 1, %s1465_s18  }
  0x41   : > { %s181_s14 = sshll.u32 %s1473_s13, 4  ;;  %s1333_s29 = scalar_lea.hbm %s1793_s3, 256  ;;  %s182_s14 = int_to_ptr.vmem [resolvable:$true] %s181_s14 }
  0x42   : > { %p1334_p6 = scmp.ne.s32.totalorder %s1793_s3, %s1333_s29  ;;  %p1340_p5 = scmp.lt.u32.totalorder %s1333_s29, %s1793_s3 }
  0x44   : > { %p1336_p10 = pnand %p1334_p6, %p1571_p13 }
  0x46   : > { %p1337_p3 = pneg %p1336_p10 }
  0x48   : > { %p1342_p7 = pnand %p1340_p5, %p1337_p3 }
  0x4a   : > { %1345 = shalt.err (!%p1342_p7)
}
  0x4b   : > { %s1346_s28 = scalar_lea.vmem %s182_s14, 256  ;;  %p1354_p2 = scmp.lt.s32.totalorder %s182_s14, %s182_s14 }
  0x4c   : > { %p1347_p9 = scmp.ne.s32.totalorder %s182_s14, %s1346_s28  ;;  %p1355_p1 = scmp.lt.s32.totalorder %s1346_s28, %s1346_s28 }
  0x4e   : > { %p1349_p12 = pnand %p1347_p9, %p1571_p13  ;;  %p1356_p4 = por %p1355_p1, %p1354_p2 }
  0x50   : > { %p1350_p0 = pneg %p1349_p12 }
  0x52   : > { %p1357_p8 = pnand %p1356_p4, %p1350_p0 }
  0x54   : > { %1360 = shalt.err (!%p1357_p8)
}
  0x55   : > { %1192 = dma.hbm_to_vmem [thread:$0]  (!%p1557_p11), %s1793_s3, 256, %s182_s14, [#allocation9]  }
  0x56   : > { %s26_s8 = ssub.s32 %s1465_s18, %s1616_s20  ;;  %s29_s10 = sadd.s32 1, %s1461_s17 }
  0x57   : > { %p27_p4 = scmp.eq.s32.totalorder %s26_s8, 0  ;;  %p36_p8 = scmp.ne.s32.totalorder %s1461_s17, %s1457_s16 }
  0x58   : > { %p37_p13 = scmp.eq.s32.totalorder %s1465_s18, 0  ;;  %p1204_p6 = scmp.lt.s32.totalorder %s1465_s18, 2 }
  0x59   : > { %s1644_s26 = scalar_select %p27_p4, %s1461_s17, %s29_s10  }
  0x5a   : > { %p38_p10 = por %p37_p13, %p36_p8  ;;  %p1803_p3 = scmp.eq.s32.totalorder %s1527_s19, 1 }
  0x5b   : > { %s192_s12 = sand.u32 1, %s1461_s17   ;;  %s1165_s13 = smul.u32 1536, %s1465_s18 }
  0x5c   : > { %p1648_p5 = por %p1803_p3, %p36_p8  ;;  %s1164_s24 = smul.u32 96, %s192_s12 }
  0x5d   : > { %s1657_s14 = scalar_lea.hbm %s1790_s0, %s1165_s13  ;;  %p1659_p11 = pnand %p1204_p6, %p38_p10 }
  0x5e   : > { %s196_s5 = scalar_lea.vmem [#allocation2], %s1164_s24  ;;  %s1665_s7 = scalar_lea.sflag [#allocation3], %s192_s12 }
  0x5f   : > { %s204_s6 = sshll.u32 %s196_s5, 4  ;;  %s1361_s28 = scalar_lea.hbm %s1657_s14, 1536  ;;  %s1663_s6 = int_to_ptr.vmem [resolvable:$true] %s204_s6 }
  0x60   : > { %p1362_p7 = scmp.ne.s32.totalorder %s1657_s14, %s1361_s28  ;;  %p1363_p9 = pneg %p1659_p11 }
  0x61   : > { %s1366_s8 = scalar_lea.hbm %s1790_s0, 3072  ;;  %p1367_p2 = scmp.lt.u32.totalorder %s1657_s14, %s1790_s0 }
  0x62   : > { %p1364_p12 = pnand %p1363_p9, %p1362_p7  ;;  %p1368_p1 = scmp.lt.u32.totalorder %s1366_s8, %s1361_s28 }
  0x63   : > { %p1370_p8 = scmp.lt.u32.totalorder %s1361_s28, %s1657_s14 }
  0x64   : > { %p1365_p0 = pneg %p1364_p12  ;;  %p1369_p4 = por %p1368_p1, %p1367_p2 }
  0x66   : > { %p1371_p13 = por %p1370_p8, %p1369_p4 }
  0x68   : > { %p1372_p6 = pnand %p1371_p13, %p1365_p0 }
  0x6a   : > { %1375 = shalt.err (!%p1372_p6)
}
  0x6b   : > { %s1376_s12 = scalar_lea.vmem %s1663_s6, 1536  ;;  %s1474_s24 = smov [#allocation2]  }
  0x6c   : > { %p1377_p10 = scmp.ne.s32.totalorder %s1663_s6, %s1376_s12  ;;  %s1381_s27 = sshll.u32 %s1474_s24, 4  ;;  %s1382_s27 = int_to_ptr.vmem [resolvable:$false] %s1381_s27 }
  0x6d   : > { %s1383_s29 = scalar_lea.vmem %s1382_s27, 3072  ;;  %p1384_p12 = scmp.lt.s32.totalorder %s1663_s6, %s1382_s27 }
  0x6e   : > { %p1379_p3 = pnand %p1377_p10, %p1363_p9  ;;  %p1385_p2 = scmp.lt.s32.totalorder %s1383_s29, %s1376_s12 }
  0x70   : > { %p1380_p7 = pneg %p1379_p3  ;;  %p1386_p1 = por %p1385_p2, %p1384_p12 }
  0x72   : > { %p1387_p4 = pnand %p1386_p1, %p1380_p7 }
  0x74   : > { %1390 = shalt.err (!%p1387_p4)
}
  0x75   : > { %s1475_s5 = smov 384   ;;  %s1476_s28 = smov 24  }
  0x76   : > { %1196 = dma.hbm_to_vmem [thread:$0]  (!%p1659_p11), %s1657_s14, 1536, %s1663_s6, %s1665_s7, %s1475_s5, %s1475_s5, %s1476_s28  }
  0x77   : > { %p1806_p9 = scmp.ne.s32.totalorder %s1800_s23, 0 }
  0x78   : > { %s1696_s25 = sand.u32 (!%p1806_p9), 1, %s1457_s16   ;;  %p1807_p0 = scmp.ne.s32.totalorder (!%p1806_p9), %s1798_s21, 0 }
  0x79   : > { %216 = sbr.rel (%p1806_p9) target bundleno = 1594 (0x63a), region = 36  ;;  %s219_s8 = scalar_lea.sflag (!%p1806_p9), [#allocation3], %s1696_s25 }
  0x7a   : > { %s1166_s9 = smul.u32 (!%p1806_p9), 96, %s1696_s25 }
  0x7c   : > { %s1700_s10 = scalar_lea.vmem (!%p1806_p9), [#allocation2], %s1166_s9 }
  0x80   : > { %1436 = dma.done.wait (%p1807_p0), %s219_s8, 1536  }
  0x81   : > { %1438 = vsyncadd (%p1807_p0), %s219_s8, 4294965760  ;;  %p1808_p11 = scmp.eq.s32.totalorder %s1527_s19, 0 }
  0x83   : > { %1440 = dma.done.wait (%p1808_p11), [#allocation6], 14336   ;;  %p1809_p8 = pmov %p1808_p11 }
  0x85   : > { %1442 = vsyncadd (%p1809_p8), [#allocation6], 4294952960  ;;  %p1810_p13 = pmov %p1809_p8 }
  0x86   : > { %p1811_p6 = pmov %p1809_p8 }
  0x87   : > { %1444 = dma.done.wait (%p1810_p13), [#allocation9], 256  }
  0x88   : > { %1446 = vsyncadd (%p1811_p6), [#allocation9], 4294967040  ;;  %v1477_v0 = vmov 0.0   ;;  %v290_v1 = vld [vmem:[#allocation5 + $0x8] sm:$0xff]  ;;  %v292_v2 = vld [vmem:[#allocation5 + $0x18] sm:$0xff]  ;;  %s955_s21 = sshll.u32 %s1696_s25, 5 }
  0x89   : > { %550 = vmatprep.mubr.f32.mxu1 %v1477_v0  ;;  %v289_v3 = vld [vmem:[#allocation5] sm:$0xff]  ;;  %v1020_v4 = vpack.c.bf16 %v292_v2, %v290_v1  ;;  %v291_v5 = vld [vmem:[#allocation5 + $0x10] sm:$0xff]  ;;  %v294_v6 = vld [vmem:[#allocation5 + $0x28] sm:$0xff]  ;;  %s258_s23 = scalar_lea.vmem [#allocation10], %s955_s21  ;;  %s961_s14 = sshll.u32 %s1527_s19, 9 }
  0x8a   : > { %v296_v7 = vld [vmem:[#allocation5 + $0x38] sm:$0xff]  ;;  %v1022_v8 = vpack.c.bf16 %v291_v5, %v289_v3  ;;  %v293_v10 = vld [vmem:[#allocation5 + $0x20] sm:$0xff]  ;;  %v295_v11 = vld [vmem:[#allocation5 + $0x30] sm:$0xff]  ;;  %s840_s30 = sshll.u32 %s258_s23, 4  ;;  %s1744_s13 = scalar_lea.hbm %s1794_s4, %s961_s14  ;;  %s1746_s30 = int_to_ptr.vmem [resolvable:$true] %s840_s30 }
  0x8b   : > { %v1024_v9 = vpack.c.bf16 %v296_v7, %v294_v6  ;;  %v298_v12 = vld [vmem:[#allocation5 + $0x48] sm:$0xff]  ;;  %1021 = vmatprep.subr.bf16.mxu0 %v1020_v4  ;;  %v300_v13 = vld [vmem:[#allocation5 + $0x58] sm:$0xff]  ;;  %v1026_v14 = vpack.c.bf16 %v295_v11, %v293_v10  ;;  %v297_v16 = vld [vmem:[#allocation5 + $0x40] sm:$0xff]  ;;  %s827_s12 = scalar_lea.sflag [#allocation4], %s1696_s25  ;;  %s1391_s24 = scalar_lea.vmem %s1746_s30, 512 }
  0x8c   : > { %1023 = vmatpush1.bf16.msra.mxu0 %v1022_v8  ;;  %v1028_v15 = vpack.c.bf16 %v300_v13, %v298_v12  ;;  %v299_v17 = vld [vmem:[#allocation5 + $0x50] sm:$0xff]  ;;  %v302_v18 = vld [vmem:[#allocation5 + $0x68] sm:$0xff]  ;;  %v304_v19 = vld [vmem:[#allocation5 + $0x78] sm:$0xff]  ;;  %p1392_p10 = scmp.ne.s32.totalorder %s1746_s30, %s1391_s24  ;;  %s1478_s19 = smov [#allocation10]  }
  0x8d   : > { %1025 = vmatprep.subr.bf16.mxu0 %v1024_v9  ;;  %v1030_v20 = vpack.c.bf16 %v299_v17, %v297_v16  ;;  %v1032_v21 = vpack.c.bf16 %v304_v19, %v302_v18  ;;  %v301_v22 = vld [vmem:[#allocation5 + $0x60] sm:$0xff]  ;;  %v303_v23 = vld [vmem:[#allocation5 + $0x70] sm:$0xff]  ;;  %v306_v24 = vld [vmem:[#allocation5 + $0x88] sm:$0xff]  ;;  %s1395_s27 = sshll.u32 %s1478_s19, 4  ;;  %s1396_s27 = int_to_ptr.vmem [resolvable:$false] %s1395_s27 }
  0x8e   : > { %v308_v25 = vld [vmem:[#allocation5 + $0x98] sm:$0xff]  ;;  %v1034_v26 = vpack.c.bf16 %v303_v23, %v301_v22  ;;  %v354_v27 = vld [vmem:[#allocation5 + $0x208] sm:$0xff]  ;;  %v353_v29 = vld [vmem:[#allocation5 + $0x200] sm:$0xff]  ;;  %p1393_p3 = pnand %p1392_p10, %p1648_p5  ;;  %s1397_s29 = scalar_lea.vmem %s1396_s27, 1024 }
  0x8f   : > { %v356_v28 = vld [vmem:[#allocation5 + $0x218] sm:$0xff]  ;;  %v1036_v30 = vpack.c.bf16 %v308_v25, %v306_v24  ;;  %v305_v31 = vld [vmem:[#allocation5 + $0x80] sm:$0xff]  ;;  %v307_v32 = vld [vmem:[#allocation5 + $0x90] sm:$0xff]  ;;  %p1398_p12 = scmp.lt.s32.totalorder %s1746_s30, %s1396_s27  ;;  %p1399_p2 = scmp.lt.s32.totalorder %s1397_s29, %s1391_s24 }
  0x90   : > { %1027 = vmatpush1.bf16.msra.mxu0 %v1026_v14  ;;  %v1084_v33 = vpack.c.bf16 %v356_v28, %v354_v27  ;;  %v355_v34 = vld [vmem:[#allocation5 + $0x210] sm:$0xff]  ;;  %v310_v35 = vld [vmem:[#allocation5 + $0xa8] sm:$0xff]  ;;  %v312_v36 = vld [vmem:[#allocation5 + $0xb8] sm:$0xff]  ;;  %v1038_v42 = vpack.c.bf16 %v307_v32, %v305_v31  ;;  %p1394_p7 = pneg %p1393_p3 }
  0x91   : > { %1029 = vmatprep.subr.bf16.mxu0 %v1028_v15  ;;  %v1086_v37 = vpack.c.bf16 %v355_v34, %v353_v29  ;;  %v358_v38 = vld [vmem:[#allocation5 + $0x228] sm:$0xff]  ;;  %v360_v39 = vld [vmem:[#allocation5 + $0x238] sm:$0xff]  ;;  %v357_v40 = vld [vmem:[#allocation5 + $0x220] sm:$0xff]  ;;  %v1040_v47 = vpack.c.bf16 %v312_v36, %v310_v35  ;;  %p1400_p1 = por %p1399_p2, %p1398_p12 }
  0x92   : > { %1085 = vmatprep.subr.bf16.mxu1 %v1084_v33  ;;  %v359_v41 = vld [vmem:[#allocation5 + $0x230] sm:$0xff]  ;;  %v309_v43 = vld [vmem:[#allocation5 + $0xa0] sm:$0xff]  ;;  %v1088_v45 = vpack.c.bf16 %v360_v39, %v358_v38  ;;  %v314_v48 = vld [vmem:[#allocation5 + $0xc8] sm:$0xff] }
  0x93   : > { %v311_v44 = vld [vmem:[#allocation5 + $0xb0] sm:$0xff]  ;;  %1087 = vmatpush1.bf16.msra.mxu1 %v1086_v37  ;;  %v1090_v46 = vpack.c.bf16 %v359_v41, %v357_v40  ;;  %v362_v49 = vld [vmem:[#allocation5 + $0x248] sm:$0xff]  ;;  %v364_v50 = vld [vmem:[#allocation5 + $0x258] sm:$0xff]  ;;  %p1401_p4 = pnand %p1400_p1, %p1394_p7 }
  0x94   : > { %1031 = vmatpush1.bf16.msra.mxu0 %v1030_v20  ;;  %v316_v51 = vld [vmem:[#allocation5 + $0xd8] sm:$0xff]  ;;  %1089 = vmatprep.subr.bf16.mxu1 %v1088_v45  ;;  %v1092_v52 = vpack.c.bf16 %v364_v50, %v362_v49  ;;  %v361_v53 = vld [vmem:[#allocation5 + $0x240] sm:$0xff]  ;;  %v363_v54 = vld [vmem:[#allocation5 + $0x250] sm:$0xff]  ;;  %v1042_v55 = vpack.c.bf16 %v311_v44, %v309_v43 }
  0x95   : > { %1033 = vmatprep.subr.bf16.mxu0 %v1032_v21  ;;  %v313_v56 = vld [vmem:[#allocation5 + $0xc0] sm:$0xff]  ;;  %v1094_v57 = vpack.c.bf16 %v363_v54, %v361_v53  ;;  %v366_v58 = vld [vmem:[#allocation5 + $0x268] sm:$0xff]  ;;  %v368_v59 = vld [vmem:[#allocation5 + $0x278] sm:$0xff]  ;;  %v1044_v60 = vpack.c.bf16 %v316_v51, %v314_v48 }
  0x96   : > { %v315_v61 = vld [vmem:[#allocation5 + $0xd0] sm:$0xff]  ;;  %v1096_v62 = vpack.c.bf16 %v368_v59, %v366_v58  ;;  %v365_v63 = vld [vmem:[#allocation5 + $0x260] sm:$0xff]  ;;  %v318_v2 = vld [vmem:[#allocation5 + $0xe8] sm:$0xff] }
  0x97   : > { %1091 = vmatpush1.bf16.msra.mxu1 %v1090_v46  ;;  %v367_v1 = vld [vmem:[#allocation5 + $0x270] sm:$0xff]  ;;  %v320_v3 = vld [vmem:[#allocation5 + $0xf8] sm:$0xff]  ;;  %v370_v4 = vld [vmem:[#allocation5 + $0x288] sm:$0xff]  ;;  %v1046_v6 = vpack.c.bf16 %v315_v61, %v313_v56 }
  0x98   : > { %1035 = vmatpush1.bf16.msra.mxu0 %v1034_v26  ;;  %1093 = vmatprep.subr.bf16.mxu1 %v1092_v52  ;;  %v372_v5 = vld [vmem:[#allocation5 + $0x298] sm:$0xff]  ;;  %v317_v7 = vld [vmem:[#allocation5 + $0xe0] sm:$0xff]  ;;  %v319_v8 = vld [vmem:[#allocation5 + $0xf0] sm:$0xff]  ;;  %v1098_v9 = vpack.c.bf16 %v367_v1, %v365_v63  ;;  %v1048_v10 = vpack.c.bf16 %v320_v3, %v318_v2 }
  0x99   : > { %1037 = vmatprep.subr.bf16.mxu0 %v1036_v30  ;;  %v322_v11 = vld [vmem:[#allocation5 + $0x108] sm:$0xff]  ;;  %v1100_v12 = vpack.c.bf16 %v372_v5, %v370_v4  ;;  %v369_v13 = vld [vmem:[#allocation5 + $0x280] sm:$0xff]  ;;  %v371_v14 = vld [vmem:[#allocation5 + $0x290] sm:$0xff]  ;;  %v1050_v18 = vpack.c.bf16 %v319_v8, %v317_v7 }
  0x9a   : > { %v324_v15 = vld [vmem:[#allocation5 + $0x118] sm:$0xff]  ;;  %v374_v16 = vld [vmem:[#allocation5 + $0x2a8] sm:$0xff]  ;;  %v321_v19 = vld [vmem:[#allocation5 + $0x100] sm:$0xff]  ;;  %v1102_v21 = vpack.c.bf16 %v371_v14, %v369_v13 }
  0x9b   : > { %1095 = vmatpush1.bf16.msra.mxu1 %v1094_v57  ;;  %v376_v17 = vld [vmem:[#allocation5 + $0x2b8] sm:$0xff]  ;;  %v323_v20 = vld [vmem:[#allocation5 + $0x110] sm:$0xff]  ;;  %v1052_v22 = vpack.c.bf16 %v324_v15, %v322_v11  ;;  %v326_v23 = vld [vmem:[#allocation5 + $0x128] sm:$0xff] }
  0x9c   : > { %1039 = vmatpush1.bf16.msra.mxu0 %v1038_v42  ;;  %1097 = vmatprep.subr.bf16.mxu1 %v1096_v62  ;;  %v1104_v24 = vpack.c.bf16 %v376_v17, %v374_v16  ;;  %v373_v25 = vld [vmem:[#allocation5 + $0x2a0] sm:$0xff]  ;;  %v375_v26 = vld [vmem:[#allocation5 + $0x2b0] sm:$0xff]  ;;  %v328_v27 = vld [vmem:[#allocation5 + $0x138] sm:$0xff]  ;;  %v1054_v30 = vpack.c.bf16 %v323_v20, %v321_v19 }
  0x9d   : > { %1041 = vmatprep.subr.bf16.mxu0 %v1040_v47  ;;  %v378_v28 = vld [vmem:[#allocation5 + $0x2c8] sm:$0xff]  ;;  %v380_v29 = vld [vmem:[#allocation5 + $0x2d8] sm:$0xff]  ;;  %v325_v31 = vld [vmem:[#allocation5 + $0x120] sm:$0xff]  ;;  %v1106_v33 = vpack.c.bf16 %v375_v26, %v373_v25  ;;  %v1056_v35 = vpack.c.bf16 %v328_v27, %v326_v23 }
  0x9e   : > { %v327_v32 = vld [vmem:[#allocation5 + $0x130] sm:$0xff]  ;;  %v262_v34 = vld [vmem:[%s1700_s10 + $0x8] sm:$0xff]  ;;  %v1108_v37 = vpack.c.bf16 %v380_v29, %v378_v28  ;;  %v377_v38 = vld [vmem:[#allocation5 + $0x2c0] sm:$0xff] }
  0x9f   : > { %1099 = vmatpush1.bf16.msra.mxu1 %v1098_v9  ;;  %v330_v36 = vld [vmem:[#allocation5 + $0x148] sm:$0xff]  ;;  %v379_v39 = vld [vmem:[#allocation5 + $0x2d0] sm:$0xff]  ;;  %v332_v40 = vld [vmem:[#allocation5 + $0x158] sm:$0xff]  ;;  %461 = vmatprep.mubr.f32.mxu0 %v262_v34  ;;  %v1058_v43 = vpack.c.bf16 %v327_v32, %v325_v31 }
  0xa0   : > { %1043 = vmatpush1.bf16.msra.mxu0 %v1042_v55  ;;  %1101 = vmatprep.subr.bf16.mxu1 %v1100_v12  ;;  %v382_v41 = vld [vmem:[#allocation5 + $0x2e8] sm:$0xff]  ;;  %v384_v42 = vld [vmem:[#allocation5 + $0x2f8] sm:$0xff]  ;;  %v329_v44 = vld [vmem:[#allocation5 + $0x140] sm:$0xff]  ;;  %v1110_v45 = vpack.c.bf16 %v379_v39, %v377_v38  ;;  %v1060_v46 = vpack.c.bf16 %v332_v40, %v330_v36 }
  0xa1   : > { %1045 = vmatprep.subr.bf16.mxu0 %v1044_v60  ;;  %v331_v47 = vld [vmem:[#allocation5 + $0x150] sm:$0xff]  ;;  %v1112_v48 = vpack.c.bf16 %v384_v42, %v382_v41  ;;  %v381_v49 = vld [vmem:[#allocation5 + $0x2e0] sm:$0xff]  ;;  %v334_v51 = vld [vmem:[#allocation5 + $0x168] sm:$0xff] }
  0xa2   : > { %v383_v50 = vld [vmem:[#allocation5 + $0x2f0] sm:$0xff]  ;;  %v336_v52 = vld [vmem:[#allocation5 + $0x178] sm:$0xff]  ;;  %v1062_v53 = vpack.c.bf16 %v331_v47, %v329_v44  ;;  %v333_v56 = vld [vmem:[#allocation5 + $0x160] sm:$0xff] }
  0xa3   : > { %1103 = vmatpush1.bf16.msra.mxu1 %v1102_v21  ;;  %v1114_v54 = vpack.c.bf16 %v383_v50, %v381_v49  ;;  %v1064_v55 = vpack.c.bf16 %v336_v52, %v334_v51  ;;  %v335_v57 = vld [vmem:[#allocation5 + $0x170] sm:$0xff]  ;;  %v338_v58 = vld [vmem:[#allocation5 + $0x188] sm:$0xff]  ;;  %v340_v59 = vld [vmem:[#allocation5 + $0x198] sm:$0xff] }
  0xa4   : > { %1047 = vmatpush1.bf16.msra.mxu0 %v1046_v6  ;;  %1105 = vmatprep.subr.bf16.mxu1 %v1104_v24  ;;  %v1066_v60 = vpack.c.bf16 %v335_v57, %v333_v56  ;;  %v263_v61 = vld [vmem:[%s1700_s10 + $0x10] sm:$0xff]  ;;  %v1068_v62 = vpack.c.bf16 %v340_v59, %v338_v58  ;;  %v337_v63 = vld [vmem:[#allocation5 + $0x180] sm:$0xff]  ;;  %v342_v2 = vld [vmem:[#allocation5 + $0x1a8] sm:$0xff] }
  0xa5   : > { %1049 = vmatprep.subr.bf16.mxu0 %v1048_v10  ;;  %v339_v1 = vld [vmem:[#allocation5 + $0x190] sm:$0xff]  ;;  %v344_v3 = vld [vmem:[#allocation5 + $0x1b8] sm:$0xff]  ;;  %v266_v5 = vld [vmem:[%s1700_s10 + $0x28] sm:$0xff] }
  0xa6   : > { %v1070_v4 = vpack.c.bf16 %v339_v1, %v337_v63  ;;  %v1072_v6 = vpack.c.bf16 %v344_v3, %v342_v2  ;;  %v341_v7 = vld [vmem:[#allocation5 + $0x1a0] sm:$0xff]  ;;  %v343_v8 = vld [vmem:[#allocation5 + $0x1b0] sm:$0xff]  ;;  %v346_v9 = vld [vmem:[#allocation5 + $0x1c8] sm:$0xff] }
  0xa7   : > { %1107 = vmatpush1.bf16.msra.mxu1 %v1106_v33  ;;  %v348_v10 = vld [vmem:[#allocation5 + $0x1d8] sm:$0xff]  ;;  %v1074_v11 = vpack.c.bf16 %v343_v8, %v341_v7  ;;  %v269_v12 = vld [vmem:[%s1700_s10 + $0x40] sm:$0xff]  ;;  %v347_v15 = vld [vmem:[#allocation5 + $0x1d0] sm:$0xff]  ;;  %v387_v33 = vlaneseq }
  0xa8   : > { %1051 = vmatpush1.bf16.msra.mxu0 %v1050_v18  ;;  %1109 = vmatprep.subr.bf16.mxu1 %v1108_v37  ;;  %v1076_v13 = vpack.c.bf16 %v348_v10, %v346_v9  ;;  %v345_v14 = vld [vmem:[#allocation5 + $0x1c0] sm:$0xff]  ;;  %v350_v16 = vld [vmem:[#allocation5 + $0x1e8] sm:$0xff]  ;;  %v352_v17 = vld [vmem:[#allocation5 + $0x1f8] sm:$0xff] }
  0xa9   : > { %1053 = vmatprep.subr.bf16.mxu0 %v1052_v22  ;;  %v1078_v18 = vpack.c.bf16 %v347_v15, %v345_v14  ;;  %v272_v19 = vld [vmem:[%s1700_s10 + $0x58] sm:$0xff]  ;;  %v1080_v20 = vpack.c.bf16 %v352_v17, %v350_v16  ;;  %v349_v21 = vld [vmem:[#allocation5 + $0x1e0] sm:$0xff]  ;;  %v351_v22 = vld [vmem:[#allocation5 + $0x1f0] sm:$0xff]  ;;  %v388_v36 = vshrl.u32 %v387_v33, 7 }
  0xaa   : > { %v1082_v23 = vpack.c.bf16 %v351_v22, %v349_v21  ;;  %v261_v24 = vld [vmem:[%s1700_s10] sm:$0xff]  ;;  %v264_v26 = vld [vmem:[%s1700_s10 + $0x18] sm:$0xff]  ;;  %v267_v27 = vld [vmem:[%s1700_s10 + $0x30] sm:$0xff] }
  0xab   : > { %1111 = vmatpush1.bf16.msra.mxu1 %v1110_v45  ;;  %v265_v25 = vld [vmem:[%s1700_s10 + $0x20] sm:$0xff]  ;;  %v271_v28 = vld [vmem:[%s1700_s10 + $0x50] sm:$0xff]  ;;  %v270_v29 = vld [vmem:[%s1700_s10 + $0x48] sm:$0xff]  ;;  %v389_v39 = vsub.s32 0, %v388_v36  ;;  %v393_v42 = vsub.s32 1, %v388_v36 }
  0xac   : > { %1055 = vmatpush1.bf16.msra.mxu0 %v1054_v30  ;;  %1113 = vmatprep.subr.bf16.mxu1 %v1112_v48  ;;  %v385_v41 = vld [vmem:[#allocation8] ss:$8 sm:$0x3]  ;;  %v576_v36 = vld [vmem:[#allocation8 + $0x9] ss:$0 sm:$0xff] }
  0xad   : > { %1057 = vmatprep.subr.bf16.mxu0 %v1056_v35  ;;  %v394_v44 = vrot.slane %v385_v41, %v393_v42 }
  0xaf   : > { %1115 = vmatpush1.bf16.msra.mxu1 %v1114_v54 }
  0xb0   : > { %1059 = vmatpush1.bf16.msra.mxu0 %v1058_v43  ;;  %v390_v43 = vrot.slane %v385_v41, %v389_v39 }
  0xb1   : > { %1061 = vmatprep.subr.bf16.mxu0 %v1060_v46 }
  0xb2   : > { %551 = vmatmul.mubr.f32.vlgmr.msra.gmra.mrb[0].mxu1 %v263_v61 }
  0xb3   : > { %556 = vmatprep.mubr.f32.mxu1 %v1477_v0 }
  0xb4   : > { %1063 = vmatpush1.bf16.msra.mxu0 %v1062_v53 }
  0xb5   : > { %1065 = vmatprep.subr.bf16.mxu0 %v1064_v55 }
  0xb6   : > { %557 = vmatmul.mubr.f32.gmra.mrb[2].mxu1 %v266_v5 }
  0xb7   : > { %562 = vmatprep.mubr.f32.mxu1 %v1477_v0 }
  0xb8   : > { %1067 = vmatpush1.bf16.msra.mxu0 %v1066_v60 }
  0xb9   : > { %1069 = vmatprep.subr.bf16.mxu0 %v1068_v62 }
  0xba   : > { %563 = vmatmul.mubr.f32.gmra.mrb[4].mxu1 %v269_v12 }
  0xbb   : > { %568 = vmatprep.mubr.f32.mxu1 %v1477_v0  ;;  %v268_v0 = vld [vmem:[%s1700_s10 + $0x38] sm:$0xff] }
  0xbc   : > { %1071 = vmatpush1.bf16.msra.mxu0 %v1070_v4 }
  0xbd   : > { %1073 = vmatprep.subr.bf16.mxu0 %v1072_v6 }
  0xbe   : > { %569 = vmatmul.mubr.f32.gmra.mrb[6].mxu1 %v272_v19 }
  0xc0   : > { %1075 = vmatpush1.bf16.msra.mxu0 %v1074_v11 }
  0xc1   : > { %1077 = vmatprep.subr.bf16.mxu0 %v1076_v13 }
  0xc4   : > { %1079 = vmatpush1.bf16.msra.mxu0 %v1078_v18 }
  0xc5   : > { %1081 = vmatprep.subr.bf16.mxu0 %v1080_v20 }
  0xc8   : > { %1083 = vmatpush1.bf16.msra.mxu0 %v1082_v23 }
  0xcb   : > { %462 = vmatmul.mubr.f32.vlgmr.msra.gmra.mrb[0].mxu0 %v261_v24 }
  0xcc   : > { %467 = vmatprep.mubr.f32.mxu0 %v265_v25 }
  0xcf   : > { %468 = vmatmul.mubr.f32.gmra.mrb[2].mxu0 %v264_v26 }
  0xd0   : > { %473 = vmatprep.mubr.f32.mxu0 %v268_v0 }
  0xd3   : > { %474 = vmatmul.mubr.f32.gmra.mrb[4].mxu0 %v267_v27 }
  0xd4   : > { %479 = vmatprep.mubr.f32.mxu0 %v271_v28 }
  0xd7   : > { %480 = vmatmul.mubr.f32.gmra.mrb[6].mxu0 %v270_v29 }
 0x185   : > { %v552_v30 = vpop.f32.mrb[0].mxu1 }
 0x186   : > { %v554_v31 = vpop.f32.mrb[1].mxu1 }
 0x189   : > { %v558_v32 = vpop.f32.mrb[2].mxu1 }
 0x18a   : > { %v560_v34 = vpop.f32.mrb[3].mxu1 }
 0x18d   : > { %v564_v35 = vpop.f32.mrb[4].mxu1 }
 0x18e   : > { %v566_v37 = vpop.f32.mrb[5].mxu1 }
 0x191   : > { %v570_v38 = vpop.f32.mrb[6].mxu1 }
 0x192   : > { %v572_v40 = vpop.f32.mrb[7].mxu1 }
 0x19e   : > { %v463_v45 = vpop.f32.mrb[0].mxu0 }
 0x19f   : > { %v464_v46 = vadd.f32 %v463_v45, %v390_v43  ;;  %v465_v47 = vpop.f32.mrb[1].mxu0 }
 0x1a0   : > { %v466_v48 = vadd.f32 %v465_v47, %v394_v44 }
 0x1a1   : > { %v553_v49 = vadd.f32 %v552_v30, %v464_v46 }
 0x1a2   : > { %v1730_v50 = vadd.f32 %v554_v31, %v466_v48  ;;  %v469_v51 = vpop.f32.mrb[2].mxu0 }
 0x1a3   : > { %v470_v52 = vadd.f32 %v469_v51, %v390_v43  ;;  %v471_v53 = vpop.f32.mrb[3].mxu0  ;;  %580 = vadd.xlane.f32.xlu0 %v553_v49 }
 0x1a4   : > { %v472_v54 = vadd.f32 %v471_v53, %v394_v44 }
 0x1a5   : > { %v559_v55 = vadd.f32 %v558_v32, %v470_v52 }
 0x1a6   : > { %v1732_v56 = vadd.f32 %v560_v34, %v472_v54  ;;  %v475_v57 = vpop.f32.mrb[4].mxu0  ;;  %v575_v34 = vld [vmem:[#allocation8 + $0x1] ss:$0 sm:$0xff] }
 0x1a7   : > { %v476_v58 = vadd.f32 %v475_v57, %v390_v43  ;;  %v477_v59 = vpop.f32.mrb[5].mxu0  ;;  %582 = vadd.xlane.f32.xlu0 %v559_v55  ;;  %v274_v57 = vld [vmem:[#allocation7 + $0x8] sm:$0xff] }
 0x1a8   : > { %v478_v60 = vadd.f32 %v477_v59, %v394_v44 }
 0x1a9   : > { %v565_v61 = vadd.f32 %v564_v35, %v476_v58  ;;  %v275_v58 = vld [vmem:[#allocation7 + $0x10] sm:$0xff] }
 0x1aa   : > { %v1734_v62 = vadd.f32 %v566_v37, %v478_v60  ;;  %v481_v63 = vpop.f32.mrb[6].mxu0  ;;  %v276_v60 = vld [vmem:[#allocation7 + $0x18] sm:$0xff] }
 0x1ab   : > { %v482_v1 = vadd.f32 %v481_v63, %v390_v43  ;;  %v483_v2 = vpop.f32.mrb[7].mxu0  ;;  %584 = vadd.xlane.f32.xlu1 %v565_v61  ;;  %v277_v63 = vld [vmem:[#allocation7 + $0x20] sm:$0xff] }
 0x1ac   : > { %v484_v3 = vadd.f32 %v483_v2, %v394_v44 }
 0x1ad   : > { %v571_v4 = vadd.f32 %v570_v38, %v482_v1 }
 0x1ae   : > { %v573_v5 = vadd.f32 %v572_v40, %v484_v3 }
 0x1af   : > { %586 = vadd.xlane.f32.xlu1 %v571_v4 }
 0x230   : > { %v581_v6 = vpop.xlane.xlu0 %580 }
 0x231   : > { %v589_v7 = vmul.f32 0.0078125, %v581_v6 }
 0x233   : > { %v593_v8 = vsub.f32 %v553_v49, %v589_v7 }
 0x234   : > { %v583_v9 = vpop.xlane.xlu0 %582 }
 0x235   : > { %v590_v10 = vmul.f32 0.0078125, %v583_v9  ;;  %v597_v11 = vmul.f32 %v593_v8, %v593_v8 }
 0x237   : > { %v594_v12 = vsub.f32 %v559_v55, %v590_v10  ;;  %601 = vadd.xlane.f32.xlu0 %v597_v11 }
 0x238   : > { %v585_v13 = vpop.xlane.xlu1 %584 }
 0x239   : > { %v591_v14 = vmul.f32 0.0078125, %v585_v13  ;;  %v598_v15 = vmul.f32 %v594_v12, %v594_v12 }
 0x23b   : > { %v595_v16 = vsub.f32 %v565_v61, %v591_v14  ;;  %603 = vadd.xlane.f32.xlu1 %v598_v15  ;;  %v1120_v61 = vpack.c.bf16 %v276_v60, %v275_v58 }
 0x23c   : > { %v587_v17 = vpop.xlane.xlu1 %586 }
 0x23d   : > { %v592_v18 = vmul.f32 0.0078125, %v587_v17  ;;  %v599_v19 = vmul.f32 %v595_v16, %v595_v16  ;;  %v279_v17 = vld [vmem:[#allocation7 + $0x30] sm:$0xff] }
 0x23f   : > { %v596_v20 = vsub.f32 %v571_v4, %v592_v18  ;;  %605 = vadd.xlane.f32.xlu0 %v599_v19  ;;  %v280_v18 = vld [vmem:[#allocation7 + $0x38] sm:$0xff] }
 0x240   : > { %v1128_v19 = vpack.c.bf16 %v280_v18, %v279_v17 }
 0x241   : > { %v600_v21 = vmul.f32 %v596_v20, %v596_v20 }
 0x243   : > { %607 = vadd.xlane.f32.xlu1 %v600_v21  ;;  %v282_v21 = vld [vmem:[#allocation7 + $0x48] sm:$0xff] }
 0x2c4   : > { %v602_v22 = vpop.xlane.xlu0 %601 }
 0x2c5   : > { %v609_v23 = vmul.f32 0.0078125, %v602_v22 }
 0x2c7   : > { %v613_v24 = vadd.f32 1e-05, %v609_v23  ;;  %v283_v23 = vld [vmem:[#allocation7 + $0x50] sm:$0xff] }
 0x2c8   : > { %v604_v25 = vpop.xlane.xlu1 %603 }
 0x2c9   : > { %1253 = vrsqrt.f32 %v613_v24  ;;  %v610_v26 = vmul.f32 0.0078125, %v604_v25  ;;  %v284_v24 = vld [vmem:[#allocation7 + $0x58] sm:$0xff] }
 0x2ca   : > { %v1136_v25 = vpack.c.bf16 %v284_v24, %v283_v23 }
 0x2cb   : > { %v614_v0 = vadd.f32 1e-05, %v610_v26  ;;  %v285_v26 = vld [vmem:[#allocation7 + $0x60] sm:$0xff] }
 0x2cc   : > { %v606_v27 = vpop.xlane.xlu0 %605 }
 0x2cd   : > { %1255 = vrsqrt.f32 %v614_v0  ;;  %v611_v28 = vmul.f32 0.0078125, %v606_v27  ;;  %v286_v0 = vld [vmem:[#allocation7 + $0x68] sm:$0xff] }
 0x2ce   : > { %v1140_v27 = vpack.c.bf16 %v286_v0, %v285_v26  ;;  %v578_v26 = vld [vmem:[#allocation8 + $0xa] ss:$0 sm:$0xff] }
 0x2cf   : > { %v615_v29 = vadd.f32 1e-05, %v611_v28  ;;  %v287_v28 = vld [vmem:[#allocation7 + $0x70] sm:$0xff] }
 0x2d0   : > { %v608_v30 = vpop.xlane.xlu1 %607 }
 0x2d1   : > { %1257 = vrsqrt.f32 %v615_v29  ;;  %v612_v31 = vmul.f32 0.0078125, %v608_v30  ;;  %v288_v29 = vld [vmem:[#allocation7 + $0x78] sm:$0xff] }
 0x2d2   : > { %v1144_v30 = vpack.c.bf16 %v288_v29, %v287_v28  ;;  %v579_v28 = vld [vmem:[#allocation8 + $0x3] ss:$0 sm:$0xff] }
 0x2d3   : > { %v1254_v32 = vpop.eup %1253  ;;  %v616_v33 = vadd.f32 1e-05, %v612_v31 }
 0x2d4   : > { %v621_v35 = vmul.f32 %v1254_v32, %v593_v8 }
 0x2d5   : > { %1259 = vrsqrt.f32 %v616_v33 }
 0x2d6   : > { %v625_v37 = vmul.f32 %v621_v35, %v575_v34 }
 0x2d7   : > { %v1256_v38 = vpop.eup %1255 }
 0x2d8   : > { %v629_v39 = vadd.f32 %v625_v37, %v576_v36  ;;  %v622_v40 = vmul.f32 %v1256_v38, %v594_v12 }
 0x2da   : > { %v633_v41 = vadd.f32 %v629_v39, %v1730_v50  ;;  %v626_v42 = vmul.f32 %v622_v40, %v575_v34  ;;  %v273_v50 = vld [vmem:[#allocation7] sm:$0xff] }
 0x2db   : > { %v1258_v43 = vpop.eup %1257  ;;  %v1116_v59 = vpack.c.bf16 %v274_v57, %v273_v50 }
 0x2dc   : > { %637 = vadd.xlane.f32.xlu0 %v633_v41  ;;  %v630_v44 = vadd.f32 %v626_v42, %v576_v36  ;;  %v623_v45 = vmul.f32 %v1258_v43, %v595_v16 }
 0x2dd   : > { %1117 = vmatprep.subr.bf16.mxu1 %v1116_v59 }
 0x2de   : > { %v634_v46 = vadd.f32 %v630_v44, %v1732_v56  ;;  %v627_v47 = vmul.f32 %v623_v45, %v575_v34  ;;  %v278_v56 = vld [vmem:[#allocation7 + $0x28] sm:$0xff]  ;;  %1119 = vmatpush3.bf16.msra.mxu1 %v1116_v59 }
 0x2df   : > { %v1260_v48 = vpop.eup %1259  ;;  %1121 = vmatprep.subr.bf16.mxu1 %v1120_v61  ;;  %v1124_v1 = vpack.c.bf16 %v278_v56, %v277_v63 }
 0x2e0   : > { %639 = vadd.xlane.f32.xlu1 %v634_v46  ;;  %v631_v49 = vadd.f32 %v627_v47, %v576_v36  ;;  %v624_v51 = vmul.f32 %v1260_v48, %v596_v20  ;;  %v281_v20 = vld [vmem:[#allocation7 + $0x40] sm:$0xff] }
 0x2e1   : > { %v1132_v22 = vpack.c.bf16 %v282_v21, %v281_v20 }
 0x2e2   : > { %v635_v52 = vadd.f32 %v631_v49, %v1734_v62  ;;  %v628_v53 = vmul.f32 %v624_v51, %v575_v34  ;;  %1123 = vmatpush3.bf16.msra.mxu1 %v1120_v61 }
 0x2e3   : > { %1125 = vmatprep.subr.bf16.mxu1 %v1124_v1 }
 0x2e4   : > { %641 = vadd.xlane.f32.xlu0 %v635_v52  ;;  %v632_v54 = vadd.f32 %v628_v53, %v576_v36 }
 0x2e6   : > { %v636_v55 = vadd.f32 %v632_v54, %v573_v5  ;;  %1127 = vmatpush3.bf16.msra.mxu1 %v1124_v1 }
 0x2e7   : > { %1129 = vmatprep.subr.bf16.mxu1 %v1128_v19 }
 0x2e8   : > { %643 = vadd.xlane.f32.xlu1 %v636_v55 }
 0x2ea   : > { %1131 = vmatpush3.bf16.msra.mxu1 %v1128_v19 }
 0x2eb   : > { %1133 = vmatprep.subr.bf16.mxu1 %v1132_v22 }
 0x2ee   : > { %1135 = vmatpush3.bf16.msra.mxu1 %v1132_v22 }
 0x2ef   : > { %1137 = vmatprep.subr.bf16.mxu1 %v1136_v25 }
 0x2f2   : > { %1139 = vmatpush3.bf16.msra.mxu1 %v1136_v25 }
 0x2f3   : > { %1141 = vmatprep.subr.bf16.mxu1 %v1140_v27 }
 0x2f6   : > { %1143 = vmatpush3.bf16.msra.mxu1 %v1140_v27 }
 0x2f7   : > { %1145 = vmatprep.subr.bf16.mxu1 %v1144_v30 }
 0x2fa   : > { %1147 = vmatpush3.bf16.msra.mxu1 %v1144_v30 }
 0x369   : > { %v638_v62 = vpop.xlane.xlu0 %637 }
 0x36a   : > { %v645_v2 = vmul.f32 0.0078125, %v638_v62 }
 0x36c   : > { %v649_v3 = vsub.f32 %v633_v41, %v645_v2 }
 0x36d   : > { %v640_v4 = vpop.xlane.xlu1 %639 }
 0x36e   : > { %v646_v5 = vmul.f32 0.0078125, %v640_v4  ;;  %v653_v6 = vmul.f32 %v649_v3, %v649_v3 }
 0x370   : > { %v650_v7 = vsub.f32 %v634_v46, %v646_v5  ;;  %657 = vadd.xlane.f32.xlu0 %v653_v6 }
 0x371   : > { %v642_v8 = vpop.xlane.xlu0 %641 }
 0x372   : > { %v647_v9 = vmul.f32 0.0078125, %v642_v8  ;;  %v654_v10 = vmul.f32 %v650_v7, %v650_v7 }
 0x374   : > { %v651_v11 = vsub.f32 %v635_v52, %v647_v9  ;;  %659 = vadd.xlane.f32.xlu1 %v654_v10  ;;  %v577_v52 = vld [vmem:[#allocation8 + $0x2] ss:$0 sm:$0xff] }
 0x375   : > { %v644_v12 = vpop.xlane.xlu1 %643 }
 0x376   : > { %v648_v13 = vmul.f32 0.0078125, %v644_v12  ;;  %v655_v14 = vmul.f32 %v651_v11, %v651_v11 }
 0x378   : > { %v652_v15 = vsub.f32 %v636_v55, %v648_v13  ;;  %661 = vadd.xlane.f32.xlu0 %v655_v14 }
 0x37a   : > { %v656_v16 = vmul.f32 %v652_v15, %v652_v15 }
 0x37c   : > { %663 = vadd.xlane.f32.xlu1 %v656_v16 }
 0x3fd   : > { %v658_v31 = vpop.xlane.xlu0 %657 }
 0x3fe   : > { %v665_v32 = vmul.f32 0.0078125, %v658_v31 }
 0x400   : > { %v669_v33 = vadd.f32 1e-05, %v665_v32 }
 0x401   : > { %v660_v34 = vpop.xlane.xlu1 %659 }
 0x402   : > { %1261 = vrsqrt.f32 %v669_v33  ;;  %v666_v35 = vmul.f32 0.0078125, %v660_v34 }
 0x404   : > { %v670_v36 = vadd.f32 1e-05, %v666_v35 }
 0x405   : > { %v662_v37 = vpop.xlane.xlu0 %661 }
 0x406   : > { %1263 = vrsqrt.f32 %v670_v36  ;;  %v667_v38 = vmul.f32 0.0078125, %v662_v37 }
 0x408   : > { %v671_v39 = vadd.f32 1e-05, %v667_v38 }
 0x409   : > { %v664_v40 = vpop.xlane.xlu1 %663 }
 0x40a   : > { %1265 = vrsqrt.f32 %v671_v39  ;;  %v668_v41 = vmul.f32 0.0078125, %v664_v40 }
 0x40c   : > { %v1262_v42 = vpop.eup %1261  ;;  %v672_v43 = vadd.f32 1e-05, %v668_v41 }
 0x40d   : > { %v677_v44 = vmul.f32 %v1262_v42, %v649_v3 }
 0x40e   : > { %1267 = vrsqrt.f32 %v672_v43 }
 0x40f   : > { %1014 = vmatprep.mubr.f32.mxu1 %v677_v44 }
 0x410   : > { %v1264_v45 = vpop.eup %1263 }
 0x411   : > { %v678_v46 = vmul.f32 %v1264_v45, %v650_v7 }
 0x413   : > { %1015 = vmatmul.mubr.f32.vlgmr.msra.gmra.mrb[8].mxu1 %v678_v46 }
 0x414   : > { %v1266_v47 = vpop.eup %1265 }
 0x415   : > { %v679_v48 = vmul.f32 %v1266_v47, %v651_v11 }
 0x417   : > { %1017 = vmatprep.mubr.f32.mxu1 %v679_v48 }
 0x418   : > { %v1268_v49 = vpop.eup %1267 }
 0x419   : > { %v680_v51 = vmul.f32 %v1268_v49, %v652_v15 }
 0x41b   : > { %1018 = vmatmul.mubr.f32.gmra.mrb[10].mxu1 %v680_v51 }
 0x4e6   : > { %v1016_v53 = vpop.f32.mrb[8].mxu1 }
 0x4e7   : > { %v753_v54 = vadd.f32 %v1016_v53, %v577_v52  ;;  %v747_v55 = vpop.f32.mrb[9].mxu1 }
 0x4e8   : > { %v748_v50 = vadd.f32 %v747_v55, %v577_v52 }
 0x4e9   : > { %768 = vadd.xlane.f32.xlu1 %v753_v54 }
 0x4ea   : > { %766 = vadd.xlane.f32.xlu0 %v748_v50 }
 0x4ee   : > { %v1019_v57 = vpop.f32.mrb[10].mxu1 }
 0x4ef   : > { %v763_v58 = vadd.f32 %v1019_v57, %v577_v52  ;;  %v757_v59 = vpop.f32.mrb[11].mxu1 }
 0x4f0   : > { %v758_v60 = vadd.f32 %v757_v59, %v577_v52 }
 0x4f1   : > { %772 = vadd.xlane.f32.xlu1 %v763_v58 }
 0x4f2   : > { %770 = vadd.xlane.f32.xlu0 %v758_v60 }
 0x576   : > { %v769_v61 = vpop.xlane.xlu1 %768 }
 0x577   : > { %v775_v63 = vmul.f32 0.0078125, %v769_v61  ;;  %v767_v56 = vpop.xlane.xlu0 %766 }
 0x578   : > { %v774_v1 = vmul.f32 0.0078125, %v767_v56 }
 0x579   : > { %v779_v62 = vsub.f32 %v753_v54, %v775_v63 }
 0x57a   : > { %v778_v2 = vsub.f32 %v748_v50, %v774_v1 }
 0x57b   : > { %v783_v3 = vmul.f32 %v779_v62, %v779_v62 }
 0x57c   : > { %v782_v4 = vmul.f32 %v778_v2, %v778_v2 }
 0x57d   : > { %788 = vadd.xlane.f32.xlu1 %v783_v3 }
 0x57e   : > { %v773_v5 = vpop.xlane.xlu1 %772  ;;  %786 = vadd.xlane.f32.xlu0 %v782_v4 }
 0x57f   : > { %v777_v6 = vmul.f32 0.0078125, %v773_v5  ;;  %v771_v7 = vpop.xlane.xlu0 %770 }
 0x580   : > { %v776_v8 = vmul.f32 0.0078125, %v771_v7 }
 0x581   : > { %v781_v9 = vsub.f32 %v763_v58, %v777_v6 }
 0x582   : > { %v780_v10 = vsub.f32 %v758_v60, %v776_v8 }
 0x583   : > { %v785_v11 = vmul.f32 %v781_v9, %v781_v9 }
 0x584   : > { %v784_v12 = vmul.f32 %v780_v10, %v780_v10 }
 0x585   : > { %792 = vadd.xlane.f32.xlu1 %v785_v11 }
 0x586   : > { %790 = vadd.xlane.f32.xlu0 %v784_v12 }
 0x60a   : > { %v789_v13 = vpop.xlane.xlu1 %788 }
 0x60b   : > { %v795_v14 = vmul.f32 0.0078125, %v789_v13  ;;  %v787_v15 = vpop.xlane.xlu0 %786 }
 0x60c   : > { %v794_v16 = vmul.f32 0.0078125, %v787_v15 }
 0x60d   : > { %v799_v17 = vadd.f32 1e-05, %v795_v14 }
 0x60e   : > { %v798_v18 = vadd.f32 1e-05, %v794_v16 }
 0x60f   : > { %1269 = vrsqrt.f32 %v799_v17 }
 0x610   : > { %1271 = vrsqrt.f32 %v798_v18 }
 0x612   : > { %v793_v19 = vpop.xlane.xlu1 %792 }
 0x613   : > { %v797_v20 = vmul.f32 0.0078125, %v793_v19  ;;  %v791_v21 = vpop.xlane.xlu0 %790 }
 0x614   : > { %v796_v22 = vmul.f32 0.0078125, %v791_v21 }
 0x615   : > { %v801_v23 = vadd.f32 1e-05, %v797_v20 }
 0x616   : > { %v800_v24 = vadd.f32 1e-05, %v796_v22 }
 0x617   : > { %1273 = vrsqrt.f32 %v801_v23 }
 0x618   : > { %1275 = vrsqrt.f32 %v800_v24 }
 0x619   : > { %v1270_v25 = vpop.eup %1269 }
 0x61a   : > { %v1272_v0 = vpop.eup %1271  ;;  %v807_v27 = vmul.f32 %v1270_v25, %v779_v62 }
 0x61b   : > { %v806_v29 = vmul.f32 %v1272_v0, %v778_v2 }
 0x61c   : > { %v811_v30 = vmul.f32 %v807_v27, %v578_v26 }
 0x61d   : > { %v810_v31 = vmul.f32 %v806_v29, %v578_v26 }
 0x61e   : > { %v815_v32 = vadd.f32 %v811_v30, %v579_v28 }
 0x61f   : > { %v814_v33 = vadd.f32 %v810_v31, %v579_v28 }
 0x620   : > { %v819_v34 = vmax.f32 %v815_v32, 0.0 }
 0x621   : > { %v1274_v35 = vpop.eup %1273  ;;  %v818_v36 = vmax.f32 %v814_v33, 0.0 }
 0x622   : > { %v1276_v37 = vpop.eup %1275  ;;  %823 = vst [vmem:[%s258_s23 + $0x8] sm:$0xff] %v819_v34  ;;  %v809_v38 = vmul.f32 %v1274_v35, %v781_v9 }
 0x623   : > { %822 = vst [vmem:[%s258_s23] sm:$0xff] %v818_v36  ;;  %v808_v39 = vmul.f32 %v1276_v37, %v780_v10 }
 0x624   : > { %v813_v40 = vmul.f32 %v809_v38, %v578_v26 }
 0x625   : > { %v812_v41 = vmul.f32 %v808_v39, %v578_v26 }
 0x626   : > { %v817_v42 = vadd.f32 %v813_v40, %v579_v28 }
 0x627   : > { %v816_v43 = vadd.f32 %v812_v41, %v579_v28 }
 0x628   : > { %v821_v44 = vmax.f32 %v817_v42, 0.0 }
 0x629   : > { %v820_v45 = vmax.f32 %v816_v43, 0.0 }
 0x62a   : > { %825 = vst [vmem:[%s258_s23 + $0x18] sm:$0xff] %v821_v44 }
 0x62b   : > { %824 = vst [vmem:[%s258_s23 + $0x10] sm:$0xff] %v820_v45 }
 0x62c   : > { %1404 = shalt.err (!%p1401_p4)
}
 0x62d   : > { %s1405_s5 = scalar_lea.hbm %s1744_s13, 512  ;;  %s1409_s8 = scalar_lea.hbm %s1794_s4, 1024 }
 0x62e   : > { %p1406_p9 = scmp.ne.s32.totalorder %s1744_s13, %s1405_s5  ;;  %p1410_p8 = scmp.lt.u32.totalorder %s1744_s13, %s1794_s4 }
 0x62f   : > { %p1411_p13 = scmp.lt.u32.totalorder %s1409_s8, %s1405_s5  ;;  %p1413_p10 = scmp.lt.u32.totalorder %s1405_s5, %s1744_s13 }
 0x630   : > { %p1407_p0 = pnand %p1406_p9, %p1648_p5 }
 0x631   : > { %p1412_p6 = por %p1411_p13, %p1410_p8 }
 0x632   : > { %p1408_p11 = pneg %p1407_p0 }
 0x633   : > { %p1414_p3 = por %p1413_p10, %p1412_p6 }
 0x635   : > { %p1415_p7 = pnand %p1414_p3, %p1408_p11 }
 0x637   : > { %1418 = shalt.err (!%p1415_p7)
}
 0x638   : > { %s1479_s23 = smov 128   ;;  %s1480_s14 = smov 8  }
 0x639   : > { %1181 = dma.vmem_to_hbm [thread:$0]  (%p1648_p5), %s1746_s30, 512, %s1744_s13, %s827_s12, %s1479_s23, %s1479_s23, %s1480_s14  }
 0x63a PF: > { %s855_s6 = sand.u32 1, %s1453_s15   ;;  %p1812_p12 = scmp.ne.s32.totalorder %s1799_s22, 0 }
 0x63b   : > { %p1813_p2 = scmp.ge.s32.totalorder %s1465_s18, 2  ;;  %s856_s7 = scalar_lea.sflag [#allocation4], %s855_s6 }
 0x63d   : > { %p1198_p1 = pnand %p1813_p2, %p1812_p12 }
 0x63f   : > { %1448 = dma.done.wait (!%p1198_p1), %s856_s7, 512  }
 0x640   : > { %1450 = vsyncadd (!%p1198_p1), %s856_s7, 4294966784  ;;  %p19_p4 = scmp.ge.s32.totalorder %s1616_s20, 4   ;;  %s1814_s15 = smov %s1457_s16 }
 0x641   : > { %s1815_s16 = smov %s1461_s17  ;;  %s1816_s17 = smov %s1644_s26 }
 0x642   : > { %s1817_s18 = smov %s1616_s20  ;;  %21 = sbr.rel (!%p19_p4) target bundleno = 7 (0x7), region = 93 }
 0x649   :  { %861 = vsyncpa [#allocation3], 1 }
 0x64a   :  { %863 = vsyncpa [#allocation3 + $0x1], 1 }
 0x64b   :  { %864 = vsyncpa [#allocation6], 1 }
 0x64c   :  { %865 = vsyncpa [#allocation9], 1 }
 0x64d   :  { %866 = vsyncpa [#allocation4], 1 }
 0x64e   :  { %868 = vsyncpa [#allocation4 + $0x1], 1 }

</bundles_post_ra>
